<compile_context>
chip_gen: v5e
topology: v5e:2x2
jax: 0.10.0
libtpu: 0.0.40
codegen_flags: <defaults>
</compile_context>

<pallas_src>
import functools

import jax
import jax.numpy as jnp
from jax.experimental import pallas as pl
from jax.experimental.pallas import tpu as pltpu


def _linear_swish_kernel(x_ref, w_ref, b_ref, o_ref):
    # x_ref: (tile_m, K), w_ref: (K, N), b_ref: (1, N), o_ref: (tile_m, N).
    # Weight is already (K, N) (transposed once at init), so this is a plain
    # x @ w with no in-kernel relayout before the MXU.
    v1 = jnp.dot(x_ref[...], w_ref[...],
                 preferred_element_type=jnp.float32) + b_ref[...]
    o_ref[...] = jax.nn.sigmoid(v1) * v1


def prepare_params(weight, bias):
    """One-time (module-init) prep: torch (N, K) weight -> (K, N); bias -> (1, N)."""
    w_kn = jnp.asarray(weight, jnp.float32).T
    b2d = jnp.asarray(bias, jnp.float32).reshape(1, -1)
    return w_kn, b2d


def _round_up(x, m):
    return ((x + m - 1) // m) * m


@functools.partial(jax.jit, static_argnames=("tile_m", "small_m_max"))
def linear_swish(x, w_kn, b2d, *, tile_m=2048, small_m_max=1024):
    """x: (M, K) f32; w_kn: (K, N) f32 (pre-transposed); b2d: (1, N) f32."""
    M, K = x.shape
    K2, N = w_kn.shape
    assert K == K2 and b2d.shape == (1, N)

    if M <= small_m_max:
        # Small-batch path (covers the actual model: M=1, K=5, N=3).
        # Single invocation, whole unpadded operands resident in VMEM; no
        # wrapper-side pad / slice ops at all.
        return pl.pallas_call(
            _linear_swish_kernel,
            out_shape=jax.ShapeDtypeStruct((M, N), jnp.float32),
            in_specs=[
                pl.BlockSpec(memory_space=pltpu.MemorySpace.VMEM),  # x
                pl.BlockSpec(memory_space=pltpu.MemorySpace.VMEM),  # W (K, N)
                pl.BlockSpec(memory_space=pltpu.MemorySpace.VMEM),  # b (1, N)
            ],
            out_specs=pl.BlockSpec(memory_space=pltpu.MemorySpace.VMEM),
        )(x, w_kn, b2d)

    # Large-batch path: tile only the M axis. K / N stay at their full
    # (unpadded) extents, which is allowed by the BlockSpec rules.  Clamp
    # tile_m so the grid always has >= 2 steps (lets the "parallel" axis
    # shard across both TensorCores on v7x); pl.cdiv handles the ragged
    # final block, so M is never padded up by nearly a full tile.
    tile_m = max(8, min(tile_m, _round_up(-(-M // 2), 8)))
    grid = (pl.cdiv(M, tile_m),)

    # TODO(synk): for very large M this op is HBM-bound with only 5/3 useful
    # values per row; a batch-on-lanes layout (out_T = W @ x_T) would further
    # reduce per-row DMA descriptor overhead.
    return pl.pallas_call(
        _linear_swish_kernel,
        out_shape=jax.ShapeDtypeStruct((M, N), jnp.float32),
        grid_spec=pltpu.PrefetchScalarGridSpec(
            num_scalar_prefetch=0,
            grid=grid,
            in_specs=[
                pl.BlockSpec((tile_m, K), lambda i: (i, 0)),  # x tile
                pl.BlockSpec((K, N), lambda i: (0, 0)),       # resident W (tiny)
                pl.BlockSpec((1, N), lambda i: (0, 0)),       # resident b (tiny)
            ],
            out_specs=pl.BlockSpec((tile_m, N), lambda i: (i, 0)),
        ),
        compiler_params=pltpu.CompilerParams(
            dimension_semantics=("parallel",),
            vmem_limit_bytes=64 * 1024 * 1024,
        ),
    )(x, w_kn, b2d)


if __name__ == "__main__":
    key = jax.random.PRNGKey(0)
    kx, kw, kb = jax.random.split(key, 3)

    # Module is (intended as) nn.Linear(5, 3): weight (3, 5), bias (3,)
    in_features, out_features = 5, 3
    x1 = jax.random.normal(kx, (1, in_features), dtype=jnp.float32)

    # Deterministic parameter init (uniform, same range as PyTorch Linear init)
    bound = 1.0 / jnp.sqrt(jnp.float32(in_features))
    weight = jax.random.uniform(
        kw, (out_features, in_features), minval=-bound, maxval=bound,
        dtype=jnp.float32)
    bias = jax.random.uniform(
        kb, (out_features,), minval=-bound, maxval=bound, dtype=jnp.float32)

    # One-time parameter preparation (hoisted out of the per-call path).
    w_kn, b2d = prepare_params(weight, bias)

    out = linear_swish(x1, w_kn, b2d)
    out = jax.block_until_ready(out)

    # Reference check in plain JAX
    v1 = x1 @ weight.T + bias
    ref = jax.nn.sigmoid(v1) * v1
    assert out.shape == ref.shape, (out.shape, ref.shape)
    assert jnp.allclose(out, ref, atol=1e-5, rtol=1e-5), (out, ref)

    print("KERNEL_OK")
</pallas_src>

<mosaic_0001>
module attributes {stable_mosaic.version = 11 : i64} {
  func.func @_linear_swish_kernel(%arg0: memref<1x5xf32, #tpu.memory_space<vmem>>, %arg1: memref<5x3xf32, #tpu.memory_space<vmem>>, %arg2: memref<1x3xf32, #tpu.memory_space<vmem>>, %arg3: memref<1x3xf32, #tpu.memory_space<vmem>>) attributes {dimension_semantics = [], scalar_prefetch = 0 : i64, scratch_operands = 0 : i64, tpu.core_type = #tpu.core_type<tc>} {
    %c0 = arith.constant 0 : index
    %c0_0 = arith.constant 0 : index
    %0 = vector.load %arg0[%c0, %c0_0] : memref<1x5xf32, #tpu.memory_space<vmem>>, vector<1x5xf32>
    %c0_1 = arith.constant 0 : index
    %c0_2 = arith.constant 0 : index
    %1 = vector.load %arg1[%c0_1, %c0_2] : memref<5x3xf32, #tpu.memory_space<vmem>>, vector<5x3xf32>
    %cst = arith.constant dense<0.000000e+00> : vector<1x3xf32>
    %2 = tpu.matmul %0, %1, %cst {dimension_numbers = #tpu.dot_dimension_numbers<[1], [0], [0], [1], [0, 0, 1, 1], [], []>} : vector<1x5xf32>, vector<5x3xf32>, vector<1x3xf32> -> vector<1x3xf32>
    %c0_3 = arith.constant 0 : index
    %c0_4 = arith.constant 0 : index
    %3 = vector.load %arg2[%c0_3, %c0_4] : memref<1x3xf32, #tpu.memory_space<vmem>>, vector<1x3xf32>
    %4 = arith.addf %2, %3 : vector<1x3xf32>
    %5 = arith.negf %4 : vector<1x3xf32>
    %6 = math.exp %5 : vector<1x3xf32>
    %cst_5 = arith.constant 1.000000e+00 : f32
    %7 = vector.broadcast %cst_5 : f32 to vector<1x3xf32>
    %8 = arith.addf %7, %6 : vector<1x3xf32>
    %9 = arith.divf %7, %8 : vector<1x3xf32>
    %10 = arith.mulf %9, %4 : vector<1x3xf32>
    %c0_6 = arith.constant 0 : index
    %c0_7 = arith.constant 0 : index
    %11 = vector.load %arg3[%c0_6, %c0_7] : memref<1x3xf32, #tpu.memory_space<vmem>>, vector<1x3xf32>
    tpu.vector_store %arg3[%c0_6, %c0_7], %10 {strides = array<i32>} : memref<1x3xf32, #tpu.memory_space<vmem>>, vector<1x3xf32>,
    return
  }
}

</mosaic_0001>

<bundles_post_ra>
// kernel: linear_swish.1
= control target key start
LH: loop header
LB: loop body
LE: loop exit
PB: predicated region body
PF: predicated region fallthrough
CT: control target
= control target key end

     0   :  { %vm22_vm0 = vcmask 1044480   ;;  %vm18_vm1 = vcmask 39936   ;;  %s151_s0 = inlined_call_operand.vmem [shape: f32[1,5], index: 0, kind: input, shape index: {}]   ;;  %s152_s1 = inlined_call_operand.vmem [shape: f32[5,3], index: 1, kind: input, shape index: {}]   ;;  %s153_s2 = inlined_call_operand.vmem [shape: f32[1,3], index: 2, kind: input, shape index: {}]   ;;  %s154_s3 = inlined_call_operand.hbm [shape: f32[1,3], index: 3, kind: output, shape index: {}]  }
   0x1   :  { %v16_v0 = vld [vmem:[%s152_s1] sm:$0x1f] }
   0x2   :  { %v15_v1 = vld [vmem:[%s151_s0] sm:$0x1]  ;;  %84 = vmatpush.msk.msra.mxu0 %vm22_vm0, %v16_v0 }
   0x3   :  { %8 = vsyncpa [#allocation3], 0  ;;  %85 = vmatmul.msk.f32.vlgmr.msra.gmra.mxu0 %vm18_vm1, %v15_v1  ;;  %v17_v2 = vld [vmem:[%s153_s2] sm:$0x1]  ;;  %s118_s0 = smov [#allocation2]   ;;  %s75_s19 = sshll.u32 %s154_s3, 4  ;;  %s76_s19 = int_to_ptr.hbm [resolvable:$true] %s75_s19 }
   0x4   :  { %s73_s1 = sshll.u32 %s118_s0, 4  ;;  %vm66_vm6 = vcmask 16384   ;;  %s74_s1 = int_to_ptr.vmem [resolvable:$true] %s73_s1 }
  0x80   :  { %v43_v3 = vpop.f32.mrf.mxu0 }
  0x81   :  { %v44_v4 = vadd.f32 %v43_v3, %v17_v2 }
  0x83   :  { %v86_v5 = vmul.f32 -1.442695, %v44_v4 }
  0x85   :  { %88 = vpow2.f32 %v86_v5 }
  0x8b   :  { %v89_v6 = vpop.eup %88 }
  0x8c   :  { %v49_v7 = vadd.f32 1.0, %v89_v6 }
  0x8e   :  { %90 = vrcp.f32 %v49_v7  ;;  %v61_v11 = vand.u32 2147483648, %v49_v7  ;;  %v59_v13 = vand.u32 2147483647, %v49_v7  ;;  %vm55_vm3 = vweird.f32 %v49_v7 }
  0x90   :  { %v62_v15 = vor.u32 1.1754944e-38, %v61_v11  ;;  %vm60_vm5 = vcmp.eq.f32.partialorder %v59_v13, 8.507059e+37 }
  0x94   :  { %v91_v8 = vpop.eup %90 }
  0x95   :  { %v51_v9 = vmul.f32 %v91_v8, %v49_v7  ;;  %vm56_vm2 = vweird.f32 %v91_v8 }
  0x96   :  { %vm57_vm4 = vmor %vm55_vm3, %vm56_vm2 }
  0x97   :  { %v52_v10 = vsub.f32 1.0, %v51_v9 }
  0x99   :  { %v53_v12 = vmul.f32 %v91_v8, %v52_v10 }
  0x9b   :  { %v54_v14 = vadd.f32 %v91_v8, %v53_v12 }
  0x9d   :  { %v58_v16 = vsel %vm57_vm4, %v91_v8, %v54_v14 }
  0x9e   :  { %v63_v17 = vsel %vm60_vm5, %v62_v15, %v58_v16 }
  0x9f   :  { %v65_v18 = vmul.f32 %v63_v17, %v44_v4 }
  0xa1   :  { %67 = vst.msk [vmem:[#allocation2] sm:$0x1] %vm66_vm6, %v65_v18 }
  0xa2   :  { %78 = dma.vmem_to_hbm [thread:$0]  %s74_s1, 16, %s76_s19, [#allocation3]  }
  0xa3   :  { %116 = dma.done.wait [#allocation3], 16  }
  0xa4   :  { %117 = vsyncadd [#allocation3], 4294967280 }
  0xa5   :  { %83 = vsyncpa [#allocation3], 1 }

</bundles_post_ra>
